<compile_context>
chip_gen: v6e
topology: v6e:2x2x1
jax: 0.10.0
libtpu: 0.0.40
codegen_flags: <defaults>
</compile_context>

<pallas_src>
import jax
import jax.numpy as jnp
from jax.experimental import pallas as pl
from jax.experimental.pallas import tpu as pltpu


# -----------------------------------------------------------------------------
# Pallas kernel: one graph per grid step, everything resident in VMEM.
#   a_ref    : [N, N]   bf16   normalized adjacency for this graph
#   x_ref    : [N, F]   bf16   node features for this graph
#   w_ref    : [F, Dp]  bf16   folded weights W12 = W1 @ W2, zero-padded to Dp lanes
#   b1w2_ref : [1, Dp]  f32    b1 @ W2, zero-padded
#   b2_ref   : [1, Dp]  f32    b2, zero-padded
#   o_ref    : [N, Dp]  f32    relu output (padded lanes are exactly 0)
# -----------------------------------------------------------------------------
def gcn_fused_kernel(a_ref, x_ref, w_ref, b1w2_ref, b2_ref, o_ref):
    a = a_ref[...]                                                  # [N, N] bf16

    # Folded linear stack (no activation between the two GCNConv layers).
    xw = jnp.dot(x_ref[...], w_ref[...],
                 preferred_element_type=jnp.float32)                # [N, Dp] f32
    t1 = jnp.dot(a, xw.astype(jnp.bfloat16),
                 preferred_element_type=jnp.float32)                # A @ (X W12)
    t2 = jnp.dot(a, t1.astype(jnp.bfloat16),
                 preferred_element_type=jnp.float32)                # A @ A @ (X W12)

    # Layer-1 bias propagated through the second aggregation:
    #   A @ (1_N b1W2) = rowsum(A)[:, None] * b1W2
    rowsum = jnp.sum(a.astype(jnp.float32), axis=1, keepdims=True)  # [N, 1]

    # Single fused bias add + relu (full 128-lane, unmasked store).
    o_ref[...] = jnp.maximum(t2 + rowsum * b1w2_ref[...] + b2_ref[...], 0.0)


def gcn_forward(a_hat, x, w1, b1, w2, b2):
    """relu(A @ ((A @ (X W1) + b1) W2) + b2), batched over graphs."""
    G, N, _ = a_hat.shape
    F = x.shape[-1]
    D = w2.shape[1]
    LANE = 128
    Dp = ((D + LANE - 1) // LANE) * LANE                     # lane-dense output width

    # Algebraic fold of the two linear layers (exact: no activation in between).
    w12 = (w1 @ w2).astype(jnp.float32)                      # [F, D]
    b1w2 = (b1 @ w2).astype(jnp.float32)                     # [1, D]

    # Zero-pad the tiny feature dim D -> Dp so the kernel's store is unmasked.
    w12_p = jnp.zeros((F, Dp), jnp.float32).at[:, :D].set(w12)
    b1w2_p = jnp.zeros((1, Dp), jnp.float32).at[:, :D].set(b1w2)
    b2_p = jnp.zeros((1, Dp), jnp.float32).at[:, :D].set(b2)

    # bf16 inputs, f32 accumulation inside the kernel.
    a_b = a_hat.astype(jnp.bfloat16)
    x_b = x.astype(jnp.bfloat16)
    w12_b = w12_p.astype(jnp.bfloat16)

    out_p = pl.pallas_call(
        gcn_fused_kernel,
        grid=(G,),
        out_shape=jax.ShapeDtypeStruct((G, N, Dp), jnp.float32),
        in_specs=[
            pl.BlockSpec((None, N, N), lambda g: (g, 0, 0)),   # per-graph A
            pl.BlockSpec((None, N, F), lambda g: (g, 0, 0)),   # per-graph X
            pl.BlockSpec((F, Dp), lambda g: (0, 0)),           # shared W12 (padded)
            pl.BlockSpec((1, Dp), lambda g: (0, 0)),           # shared b1W2 (padded)
            pl.BlockSpec((1, Dp), lambda g: (0, 0)),           # shared b2 (padded)
        ],
        out_specs=pl.BlockSpec((None, N, Dp), lambda g: (g, 0, 0)),
        compiler_params=pltpu.CompilerParams(
            # Graph axis is embarrassingly parallel -> megacore sharding on v7x.
            dimension_semantics=("parallel",),
        ),
    )(a_b, x_b, w12_b, b1w2_p, b2_p)

    return out_p[..., :D]


# -----------------------------------------------------------------------------
# Glue: dense normalized adjacency from edge_index (PyG GCNConv.gcn_norm).
# -----------------------------------------------------------------------------
def build_normalized_adjacency(edge_index, num_nodes):
    src = edge_index[0]  # messages flow source -> target (PyG default)
    dst = edge_index[1]
    adj = jnp.zeros((num_nodes, num_nodes), jnp.float32)
    adj = adj.at[dst, src].add(1.0)                       # A[dst, src] += w
    adj = adj + jnp.eye(num_nodes, dtype=jnp.float32)     # add self-loops (w=1)
    deg = adj.sum(axis=1)                                 # in-degree incl. self-loop
    deg_inv_sqrt = jnp.where(deg > 0, jax.lax.rsqrt(deg), 0.0)
    return deg_inv_sqrt[:, None] * adj * deg_inv_sqrt[None, :]


def glorot(key, shape):
    fan_in, fan_out = shape
    limit = jnp.sqrt(6.0 / (fan_in + fan_out))
    return jax.random.uniform(key, shape, jnp.float32, -limit, limit)


if __name__ == "__main__":
    # args.dimensions = 32, args.num_omics = 4
    dimensions = 32
    num_omics = 4
    in_channel = dimensions
    latent_layer = in_channel // 4          # 8
    dim = num_omics * (num_omics - 1)       # 12

    G = 4         # batch of graphs (amortizes launch overhead)
    N = 16        # nodes per graph
    E = 40        # directed edges per graph

    key = jax.random.PRNGKey(0)
    k_x, k_e, k_w1, k_w2 = jax.random.split(key, 4)

    x = jax.random.normal(k_x, (G, N, in_channel), jnp.float32)
    edge_index = jax.random.randint(k_e, (G, 2, E), 0, N)            # [G, 2, E]

    # Deterministic parameter init (GCNConv: glorot weights, zero bias).
    w1 = glorot(k_w1, (in_channel, latent_layer))
    b1 = jnp.zeros((1, latent_layer), jnp.float32)
    w2 = glorot(k_w2, (latent_layer, dim))
    b2 = jnp.zeros((1, dim), jnp.float32)

    a_hat = jax.vmap(lambda ei: build_normalized_adjacency(ei, N))(edge_index)

    out = gcn_forward(a_hat, x, w1, b1, w2, b2)
    out = jax.block_until_ready(out)

    # Pure-JAX f32 reference of the original (unfused) module forward.
    h1 = jnp.matmul(a_hat, jnp.matmul(x, w1)) + b1                   # conv1
    ref = jnp.maximum(jnp.matmul(a_hat, jnp.matmul(h1, w2)) + b2, 0.0)  # conv2.relu()

    assert out.shape == (G, N, dim)
    # bf16 inputs + f32 accumulation: loose tolerance vs. the f32 reference.
    assert jnp.allclose(out, ref, atol=5e-2, rtol=5e-2), (
        float(jnp.max(jnp.abs(out - ref))))

    print("KERNEL_OK")
</pallas_src>

<mosaic_0001>
module attributes {stable_mosaic.version = 11 : i64} {
  func.func @gcn_fused_kernel(%arg0: i32, %arg1: memref<1x16x16xbf16, #tpu.memory_space<vmem>>, %arg2: memref<1x16x32xbf16, #tpu.memory_space<vmem>>, %arg3: memref<32x128xbf16, #tpu.memory_space<vmem>>, %arg4: memref<1x128xf32, #tpu.memory_space<vmem>>, %arg5: memref<1x128xf32, #tpu.memory_space<vmem>>, %arg6: memref<1x16x128xf32, #tpu.memory_space<vmem>>) attributes {dimension_semantics = [#tpu.dimension_semantics<parallel>], iteration_bounds = array<i64: 4>, scalar_prefetch = 0 : i64, scratch_operands = 0 : i64, tpu.core_type = #tpu.core_type<tc>, window_params = [{transform_indices = @transform_0, window_bounds = array<i64: 1, 16, 16>}, {transform_indices = @transform_1, window_bounds = array<i64: 1, 16, 32>}, {pipeline_mode = #tpu.pipeline_mode<synchronous>, transform_indices = @transform_2, window_bounds = array<i64: 32, 128>}, {pipeline_mode = #tpu.pipeline_mode<synchronous>, transform_indices = @transform_3, window_bounds = array<i64: 1, 128>}, {pipeline_mode = #tpu.pipeline_mode<synchronous>, transform_indices = @transform_4, window_bounds = array<i64: 1, 128>}, {transform_indices = @transform_5, window_bounds = array<i64: 1, 16, 128>}]} {
    %c0 = arith.constant 0 : index
    %c0_0 = arith.constant 0 : index
    %c0_1 = arith.constant 0 : index
    %0 = vector.load %arg1[%c0, %c0_0, %c0_1] : memref<1x16x16xbf16, #tpu.memory_space<vmem>>, vector<1x16x16xbf16>
    %1 = vector.shape_cast %0 : vector<1x16x16xbf16> to vector<16x16xbf16>
    %c0_2 = arith.constant 0 : index
    %c0_3 = arith.constant 0 : index
    %c0_4 = arith.constant 0 : index
    %2 = vector.load %arg2[%c0_2, %c0_3, %c0_4] : memref<1x16x32xbf16, #tpu.memory_space<vmem>>, vector<1x16x32xbf16>
    %3 = vector.shape_cast %2 : vector<1x16x32xbf16> to vector<16x32xbf16>
    %c0_5 = arith.constant 0 : index
    %c0_6 = arith.constant 0 : index
    %4 = vector.load %arg3[%c0_5, %c0_6] : memref<32x128xbf16, #tpu.memory_space<vmem>>, vector<32x128xbf16>
    %cst = arith.constant dense<0.000000e+00> : vector<16x128xf32>
    %5 = tpu.matmul %3, %4, %cst {dimension_numbers = #tpu.dot_dimension_numbers<[1], [0], [0], [1], [0, 0, 1, 1], [], []>} : vector<16x32xbf16>, vector<32x128xbf16>, vector<16x128xf32> -> vector<16x128xf32>
    %6 = arith.truncf %5 : vector<16x128xf32> to vector<16x128xbf16>
    %cst_7 = arith.constant dense<0.000000e+00> : vector<16x128xf32>
    %7 = tpu.matmul %1, %6, %cst_7 {dimension_numbers = #tpu.dot_dimension_numbers<[1], [0], [0], [1], [0, 0, 1, 1], [], []>} : vector<16x16xbf16>, vector<16x128xbf16>, vector<16x128xf32> -> vector<16x128xf32>
    %8 = arith.truncf %7 : vector<16x128xf32> to vector<16x128xbf16>
    %cst_8 = arith.constant dense<0.000000e+00> : vector<16x128xf32>
    %9 = tpu.matmul %1, %8, %cst_8 {dimension_numbers = #tpu.dot_dimension_numbers<[1], [0], [0], [1], [0, 0, 1, 1], [], []>} : vector<16x16xbf16>, vector<16x128xbf16>, vector<16x128xf32> -> vector<16x128xf32>
    %10 = arith.extf %1 : vector<16x16xbf16> to vector<16x16xf32>
    %cst_9 = arith.constant dense<0.000000e+00> : vector<16xf32>
    %11 = vector.multi_reduction <add>, %10, %cst_9 [1] : vector<16x16xf32> to vector<16xf32>
    %12 = vector.shape_cast %11 : vector<16xf32> to vector<16x1xf32>
    %c0_10 = arith.constant 0 : index
    %c0_11 = arith.constant 0 : index
    %13 = vector.load %arg4[%c0_10, %c0_11] : memref<1x128xf32, #tpu.memory_space<vmem>>, vector<1x128xf32>
    %14 = vector.broadcast %12 : vector<16x1xf32> to vector<16x128xf32>
    %15 = vector.broadcast %13 : vector<1x128xf32> to vector<16x128xf32>
    %16 = arith.mulf %14, %15 : vector<16x128xf32>
    %17 = arith.addf %9, %16 : vector<16x128xf32>
    %c0_12 = arith.constant 0 : index
    %c0_13 = arith.constant 0 : index
    %18 = vector.load %arg5[%c0_12, %c0_13] : memref<1x128xf32, #tpu.memory_space<vmem>>, vector<1x128xf32>
    %19 = vector.broadcast %18 : vector<1x128xf32> to vector<16x128xf32>
    %20 = arith.addf %17, %19 : vector<16x128xf32>
    %cst_14 = arith.constant 0.000000e+00 : f32
    %21 = vector.broadcast %cst_14 : f32 to vector<16x128xf32>
    %22 = arith.maximumf %20, %21 : vector<16x128xf32>
    %c0_15 = arith.constant 0 : index
    %c0_16 = arith.constant 0 : index
    %c0_17 = arith.constant 0 : index
    %23 = vector.load %arg6[%c0_15, %c0_16, %c0_17] : memref<1x16x128xf32, #tpu.memory_space<vmem>>, vector<1x16x128xf32>
    %24 = vector.shape_cast %23 : vector<1x16x128xf32> to vector<16x128xf32>
    %25 = vector.shape_cast %22 : vector<16x128xf32> to vector<1x16x128xf32>
    tpu.vector_store %arg6[%c0_15, %c0_16, %c0_17], %25 {strides = array<i32>} : memref<1x16x128xf32, #tpu.memory_space<vmem>>, vector<1x16x128xf32>,
    return
  }
  func.func @transform_0(%arg0: i32) -> (i32, i32, i32) {
    %c0_i32 = arith.constant 0 : i32
    %c0_i32_0 = arith.constant 0 : i32
    %c0_i32_1 = arith.constant 0 : i32
    return %arg0, %c0_i32, %c0_i32_0 : i32, i32, i32
  }
  func.func @transform_1(%arg0: i32) -> (i32, i32, i32) {
    %c0_i32 = arith.constant 0 : i32
    %c0_i32_0 = arith.constant 0 : i32
    %c0_i32_1 = arith.constant 0 : i32
    return %arg0, %c0_i32, %c0_i32_0 : i32, i32, i32
  }
  func.func @transform_2(%arg0: i32) -> (i32, i32) {
    %c0_i32 = arith.constant 0 : i32
    %c0_i32_0 = arith.constant 0 : i32
    %c0_i32_1 = arith.constant 0 : i32
    return %c0_i32, %c0_i32_0 : i32, i32
  }
  func.func @transform_3(%arg0: i32) -> (i32, i32) {
    %c0_i32 = arith.constant 0 : i32
    %c0_i32_0 = arith.constant 0 : i32
    %c0_i32_1 = arith.constant 0 : i32
    return %c0_i32, %c0_i32_0 : i32, i32
  }
  func.func @transform_4(%arg0: i32) -> (i32, i32) {
    %c0_i32 = arith.constant 0 : i32
    %c0_i32_0 = arith.constant 0 : i32
    %c0_i32_1 = arith.constant 0 : i32
    return %c0_i32, %c0_i32_0 : i32, i32
  }
  func.func @transform_5(%arg0: i32) -> (i32, i32, i32) {
    %c0_i32 = arith.constant 0 : i32
    %c0_i32_0 = arith.constant 0 : i32
    %c0_i32_1 = arith.constant 0 : i32
    return %arg0, %c0_i32, %c0_i32_0 : i32, i32, i32
  }
}

</mosaic_0001>

<bundles_post_ra>
// kernel: tpu_custom_call.1
= control target key start
LH: loop header
LB: loop body
LE: loop exit
PB: predicated region body
PF: predicated region fallthrough
CT: control target
= control target key end

     0   :  { %s1181_s0 = inlined_call_operand.hbm [shape: bf16[4,16,16], index: 0, kind: input, shape index: {}]   ;;  %s1182_s1 = inlined_call_operand.hbm [shape: bf16[4,16,32], index: 1, kind: input, shape index: {}]   ;;  %s1183_s2 = inlined_call_operand.hbm [shape: bf16[32,128], index: 2, kind: input, shape index: {}]   ;;  %s1184_s3 = inlined_call_operand.vmem [shape: f32[1,128], index: 3, kind: input, shape index: {}]   ;;  %s1185_s4 = inlined_call_operand.vmem [shape: f32[1,128], index: 4, kind: input, shape index: {}]   ;;  %s1186_s5 = inlined_call_operand.hbm [shape: f32[4,16,128], index: 5, kind: output, shape index: {}]  }
   0x1   :  { %1195 = sst [smem:[#allocation15_spill]] %s1181_s0 }
   0x2   :  { %1196 = sst [smem:[#allocation16_spill]] %s1183_s2 }
   0x3   :  { %10 = vsyncpa [#allocation3], 0 }
   0x4   :  { %12 = vsyncpa [#allocation3 + $0x1], 0 }
   0x5   :  { %13 = vsyncpa [#allocation6], 0 }
   0x6   :  { %15 = vsyncpa [#allocation6 + $0x1], 0 }
   0x7   :  { %16 = vsyncpa [#allocation4], 0 }
   0x8   :  { %18 = vsyncpa [#allocation4 + $0x1], 0  ;;  %s938_s18 = smov 0   ;;  %s940_s19 = smov 0  }
   0x9   :  { %s942_s20 = smov 0   ;;  %s944_s21 = smov 0  }
   0xa LB: > { %1197 = sst [smem:[#allocation13_spill]] %s892_s20  ;;  %s959_s22 = sadd.s32 4294967295, %s896_s21   ;;  %s896_s21 = sphi %s944_s21, %s1219_s21   ;;  %s892_s20 = sphi %s942_s20, %s1216_s20   ;;  %s888_s19 = sphi %s940_s19, %s1218_s19   ;;  %s884_s18 = sphi %s938_s18, %s1217_s18  }
   0xb   : > { %s610_s23 = sadd.s32 4294967294, %s896_s21   ;;  %p44_p0 = scmp.ne.s32.totalorder %s888_s19, %s884_s18 }
   0xc   : > { %p1191_p1 = scmp.eq.s32.totalorder %s959_s22, 0  ;;  %p163_p3 = scmp.eq.s32.totalorder %s610_s23, 3 }
   0xd   : > { %p611_p5 = scmp.ge.s32.totalorder %s896_s21, 1  ;;  %p170_p7 = scmp.lt.s32.totalorder %s896_s21, 5 }
   0xe   : > { %p968_p4 = por %p1191_p1, %p44_p0  ;;  %p973_p6 = por %p163_p3, %p44_p0 }
   0xf   : > { %p978_p8 = pnand %p611_p5, %p170_p7  ;;  %s898_s27 = smov [#allocation7]  }
  0x10   : > { %s1198_s24 = scalar_select %p968_p4, 1, 0 }
  0x11   : > { %s1199_s25 = scalar_select %p973_p6, 1, 0 }
  0x12   : > { %s182_s28 = sshll.u32 %s898_s27, 4  ;;  %p679_p9 = pneg %p978_p8  ;;  %s183_s28 = int_to_ptr.vmem [resolvable:$true] %s182_s28 }
  0x13   : > { %s991_s30 = sadd.s32 1, %s896_s21   ;;  %s31_s6 = sadd.s32 1, %s892_s20 }
  0x14   : > { %p986_p10 = pnand %p679_p9, %p1191_p1  ;;  %s28_s7 = ssub.s32 %s896_s21, %s991_s30 }
  0x15   : > { %s753_s8 = scalar_lea.vmem %s183_s28, 256  ;;  %p761_p3 = scmp.lt.s32.totalorder %s183_s28, %s183_s28 }
  0x16   : > { %p744_p11 = pneg %p986_p10  ;;  %p754_p12 = scmp.ne.s32.totalorder %s183_s28, %s753_s8 }
  0x17   : > { %p762_p5 = scmp.lt.s32.totalorder %s753_s8, %s753_s8 }
  0x18   : > { %p756_p13 = pnand %p754_p12, %p744_p11 }
  0x19   : > { %p763_p7 = por %p762_p5, %p761_p3 }
  0x1a   : > { %p757_p0 = pneg %p756_p13 }
  0x1c   : > { %p764_p2 = pnand %p763_p7, %p757_p0 }
  0x1e   : > { %767 = shalt.err (!%p764_p2)
}
  0x1f   : > { %s1187_s9 = smov 64   ;;  %s1189_s10 = smov 4  }
  0x20   : > { %s1202_s2 = sld [smem:[#allocation16_spill]]  ;;  %p29_p2 = scmp.eq.s32.totalorder %s28_s7, 0 }
  0x21   : > { %p38_p9 = scmp.ne.s32.totalorder %s892_s20, %s888_s19  ;;  %p39_p11 = scmp.eq.s32.totalorder %s896_s21, 0 }
  0x22   : > { %p695_p12 = scmp.lt.s32.totalorder %s896_s21, 4  ;;  %p1204_p0 = scmp.eq.s32.totalorder %s959_s22, 3 }
  0x23   : > { %s1011_s13 = scalar_select %p29_p2, %s892_s20, %s31_s6  }
  0x24   : > { %p40_p13 = por %p39_p11, %p38_p9  ;;  %p1015_p3 = por %p1204_p0, %p38_p9 }
  0x25   : > { %1203 = sst [smem:[#allocation14_spill]] %s1011_s13  ;;  %s202_s15 = sand.u32 1, %s892_s20  }
  0x26   : > { %682 = dma.hbm_to_vmem [thread:$0]  (!%p986_p10), %s1202_s2, 256, %s183_s28, [#allocation6], %s1187_s9, %s1187_s9, %s1189_s10  }
  0x27   : > { %s1205_s14 = scalar_select %p1015_p3, 1, 0 }
  0x28   : > { %s639_s16 = sshll.u32 %s896_s21, 7  ;;  %s1021_s17 = sshll.u32 %s202_s15, 3 }
  0x29   : > { %s1206_s0 = sld [smem:[#allocation15_spill]]  ;;  %s206_s29 = scalar_lea.vmem [#allocation2], %s1021_s17 }
  0x2a   : > { %s213_s6 = sshll.u32 %s206_s29, 4  ;;  %p1029_p10 = pnand %p695_p12, %p40_p13  ;;  %s1033_s6 = int_to_ptr.vmem [resolvable:$true] %s213_s6 }
  0x2b   : > { %s1038_s12 = scalar_lea.hbm %s1182_s1, %s639_s16  ;;  %s1040_s23 = scalar_lea.sflag [#allocation3], %s202_s15 }
  0x2c   : > { %p770_p7 = pneg %p1029_p10 }
  0x2f   : > { %s1026_s28 = scalar_lea.hbm %s1206_s0, %s639_s16  ;;  %s773_s10 = scalar_lea.hbm %s1206_s0, 512 }
  0x30   : > { %s768_s27 = scalar_lea.hbm %s1026_s28, 128  ;;  %p774_p11 = scmp.lt.s32.totalorder %s1026_s28, %s1206_s0 }
  0x31   : > { %p769_p5 = scmp.ne.s32.totalorder %s1026_s28, %s768_s27  ;;  %p775_p12 = scmp.lt.s32.totalorder %s773_s10, %s768_s27 }
  0x33   : > { %p771_p2 = pnand %p770_p7, %p769_p5  ;;  %p776_p13 = por %p775_p12, %p774_p11 }
  0x35   : > { %p772_p9 = pneg %p771_p2 }
  0x37   : > { %p777_p0 = pnand %p776_p13, %p772_p9 }
  0x39   : > { %780 = shalt.err (!%p777_p0)
}
  0x3a   : > { %s781_s15 = scalar_lea.vmem %s1033_s6, 128  ;;  %s901_s9 = smov [#allocation2]  }
  0x3b   : > { %p782_p1 = scmp.ne.s32.totalorder %s1033_s6, %s781_s15  ;;  %s786_s16 = sshll.u32 %s901_s9, 4  ;;  %s787_s16 = int_to_ptr.vmem [resolvable:$false] %s786_s16 }
  0x3c   : > { %s788_s8 = scalar_lea.vmem %s787_s16, 256  ;;  %p789_p6 = scmp.lt.s32.totalorder %s1033_s6, %s787_s16 }
  0x3d   : > { %p784_p5 = pnand %p782_p1, %p770_p7  ;;  %p790_p3 = scmp.lt.s32.totalorder %s788_s8, %s781_s15 }
  0x3f   : > { %p785_p2 = pneg %p784_p5  ;;  %p791_p4 = por %p790_p3, %p789_p6 }
  0x41   : > { %p792_p11 = pnand %p791_p4, %p785_p2 }
  0x43   : > { %795 = shalt.err (!%p792_p11)
}
  0x44   : > { %s1208_s2 = smov 4   ;;  %s1209_s10 = smov 64  }
  0x45   : > { %686 = dma.hbm_to_vmem [thread:$0]  (!%p1029_p10), %s1026_s28, 128, %s1033_s6, %s1040_s23, %s1209_s10, %s1209_s10, %s1208_s2  }
  0x46   : > { %s227_s13 = scalar_lea.vmem [#allocation5], %s1021_s17  ;;  %s223_s27 = sand.u32 1, %s896_s21  }
  0x47   : > { %s234_s11 = sshll.u32 %s227_s13, 4  ;;  %s224_s29 = scalar_lea.sflag [#allocation6], %s223_s27  ;;  %s1072_s11 = int_to_ptr.vmem [resolvable:$true] %s234_s11 }
  0x48   : > { %s796_s15 = scalar_lea.hbm %s1038_s12, 128  ;;  %s801_s8 = scalar_lea.hbm %s1182_s1, 512 }
  0x49   : > { %p797_p1 = scmp.ne.s32.totalorder %s1038_s12, %s796_s15  ;;  %p802_p3 = scmp.lt.s32.totalorder %s1038_s12, %s1182_s1 }
  0x4a   : > { %p803_p9 = scmp.lt.s32.totalorder %s801_s8, %s796_s15 }
  0x4b   : > { %p799_p4 = pnand %p797_p1, %p770_p7 }
  0x4c   : > { %p804_p12 = por %p803_p9, %p802_p3 }
  0x4d   : > { %p800_p6 = pneg %p799_p4 }
  0x4f   : > { %p805_p13 = pnand %p804_p12, %p800_p6 }
  0x51   : > { %808 = shalt.err (!%p805_p13)
}
  0x52   : > { %s809_s17 = scalar_lea.vmem %s1072_s11, 128  ;;  %s902_s28 = smov [#allocation5]  }
  0x53   : > { %p810_p0 = scmp.ne.s32.totalorder %s1072_s11, %s809_s17  ;;  %s814_s6 = sshll.u32 %s902_s28, 4  ;;  %s815_s6 = int_to_ptr.vmem [resolvable:$false] %s814_s6 }
  0x54   : > { %s816_s23 = scalar_lea.vmem %s815_s6, 256  ;;  %p817_p11 = scmp.lt.s32.totalorder %s1072_s11, %s815_s6 }
  0x55   : > { %p812_p5 = pnand %p810_p0, %p770_p7  ;;  %p818_p1 = scmp.lt.s32.totalorder %s816_s23, %s809_s17 }
  0x57   : > { %p813_p2 = pneg %p812_p5  ;;  %p819_p4 = por %p818_p1, %p817_p11 }
  0x59   : > { %p820_p3 = pnand %p819_p4, %p813_p2 }
  0x5b   : > { %823 = shalt.err (!%p820_p3)
}
  0x5c   : > { %689 = dma.hbm_to_vmem [thread:$0]  (!%p1029_p10), %s1038_s12, 128, %s1072_s11, %s224_s29, %s1209_s10, %s1209_s10, %s1208_s2  }
  0x5d   : > { %246 = sbr.rel (%p978_p8) target bundleno = 736 (0x2e0), region = 40  ;;  %s1102_s0 = sand.u32 (!%p978_p8), 1, %s888_s19  }
  0x5e   : > { %s621_s20 = sshll.u32 (!%p978_p8), %s1102_s0, 3  ;;  %s249_s13 = scalar_lea.sflag (!%p978_p8), [#allocation3], %s1102_s0 }
  0x5f   : > { %s252_s27 = scalar_lea.vmem (!%p978_p8), [#allocation2], %s621_s20  ;;  %p1210_p7 = scmp.ne.s32.totalorder (!%p978_p8), %s1198_s24, 0 }
  0x62   : > { %867 = dma.done.wait (%p1210_p7), %s249_s13, 128  }
  0x63   : > { %869 = vsyncadd (%p1210_p7), %s249_s13, 4294967168  ;;  %s257_s7 = sand.u32 1, %s959_s22   ;;  %s261_s26 = scalar_lea.vmem [#allocation5], %s621_s20 }
  0x64   : > { %s258_s12 = scalar_lea.sflag [#allocation6], %s257_s7 }
  0x65   : > { %871 = dma.done.wait (%p1210_p7), %s258_s12, 128  }
  0x66   : > { %873 = vsyncadd (%p1210_p7), %s258_s12, 4294967168  ;;  %p1211_p8 = scmp.eq.s32.totalorder %s959_s22, 0 }
  0x68   : > { %875 = dma.done.wait (%p1211_p8), [#allocation6], 256   ;;  %p1212_p10 = pmov %p1211_p8 }
  0x69   : > { %v903_v0 = vmov 0.0   ;;  %vm904_vm0 = vmmov 0   ;;  %v737_v1 = vld [vmem:[#allocation7 + $0x8] sm:$0xff]   ;;  %v738_v2 = vld [vmem:[#allocation7] sm:$0xff]   ;;  %v739_v3 = vld [vmem:[%s261_s26] sm:$0xff]   ;;  %vm323_vm1 = vcmask 261120  }
  0x6a   : > { %877 = vsyncadd (%p1212_p10), [#allocation6], 4294967040  ;;  %649 = vmatprep.subr.bf16.mxu0 %v903_v0  ;;  %653 = vmatprep.mubr.msk.bf16.mxu0 %vm904_vm0, %v903_v0  ;;  %v298_v6 = vld [vmem:[%s252_s27] sm:$0xff]   ;;  %vm374_vm2 = vcmask 130048   ;;  %s624_s10 = sshll.u32 %s1102_s0, 4  ;;  %s641_s16 = sshll.u32 %s959_s22, 8 }
  0x6b   : > { %657 = vmatprep.subr.bf16.mxu1 %v903_v0  ;;  %659 = vmatprep.mubr.msk.bf16.mxu1 %vm904_vm0, %v903_v0  ;;  %v420_v10 = vunpack.c.l.bf16 %v298_v6  ;;  %v421_v11 = vunpack.c.h.bf16 %v298_v6  ;;  %v631_v20 = vld [vmem:[%s1184_s3] ss:$0 sm:$0xff]  ;;  %s296_s15 = scalar_lea.vmem [#allocation8], %s624_s10  ;;  %s1139_s28 = scalar_lea.hbm %s1186_s5, %s641_s16 }
  0x6c   : > { %650 = vmatpush3.bf16.msra.mxu0 %v737_v1  ;;  %v633_v24 = vld [vmem:[%s1185_s4] ss:$0 sm:$0xff]  ;;  %s505_s9 = sshll.u32 %s296_s15, 4  ;;  %s492_s6 = scalar_lea.sflag [#allocation4], %s1102_s0  ;;  %s1134_s9 = int_to_ptr.vmem [resolvable:$true] %s505_s9 }
  0x6d   : > { %651 = vmatprep.subr.bf16.mxu0 %v903_v0  ;;  %v422_v12 = vsel %vm374_vm2, %v420_v10, 0.0  ;;  %v425_v13 = vsel %vm374_vm2, %v421_v11, 0.0  ;;  %s824_s23 = scalar_lea.vmem %s1134_s9, 256  ;;  %p1213_p9 = scmp.ne.s32.totalorder %s1205_s14, 0 }
  0x6e   : > { %423 = vadd.xlane.f32.xlu0 %v422_v12  ;;  %p825_p6 = scmp.ne.s32.totalorder %s1134_s9, %s824_s23  ;;  %s905_s22 = smov [#allocation8]  }
  0x6f   : > { %s828_s20 = sshll.u32 %s905_s22, 4  ;;  %s829_s20 = int_to_ptr.vmem [resolvable:$false] %s828_s20 }
  0x70   : > { %652 = vmatpush3.bf16.msra.mxu0 %v738_v2  ;;  %p826_p12 = pnand %p825_p6, %p1213_p9  ;;  %s830_s13 = scalar_lea.vmem %s829_s20, 512 }
  0x71   : > { %p831_p0 = scmp.lt.s32.totalorder %s1134_s9, %s829_s20  ;;  %p832_p5 = scmp.lt.s32.totalorder %s830_s13, %s824_s23 }
  0x72   : > { %426 = vadd.xlane.f32.xlu0 %v425_v13  ;;  %p827_p13 = pneg %p826_p12 }
  0x73   : > { %654 = vmatmul.mubr.msk.bf16.vlgmr.msra.gmra.mxu0 %vm323_vm1, %v739_v3  ;;  %p833_p2 = por %p832_p5, %p831_p0 }
  0x75   : > { %p834_p11 = pnand %p833_p2, %p827_p13 }
  0xf7   : > { %v424_v19 = vpop.xlane.xlu0 %423 }
  0xf8   : > { %v435_v21 = vmul.f32 %v631_v20, %v424_v19 }
  0xfb   : > { %v427_v22 = vpop.xlane.xlu0 %426 }
  0xfc   : > { %v436_v26 = vmul.f32 %v631_v20, %v427_v22 }
 0x133   : > { %v361_v4 = vpop.f32.mrf.mxu0 }
 0x135   : > { %v655_v5 = vpop.f32.mrf.mxu0 }
 0x137   : > { %v364_v7 = vpop.f32.mrf.mxu0 }
 0x138   : > { %v368_v8 = vpack.c.bf16 %v364_v7, %v361_v4 }
 0x139   : > { %v656_v9 = vpop.f32.mrf.mxu0 }
 0x13a   : > { %658 = vmatpush3.bf16.msra.mxu1 %v368_v8 }
 0x13b   : > { %663 = vmatprep.subr.bf16.mxu1 %v903_v0 }
 0x13d   : > { %660 = vmatmul.mubr.msk.bf16.vlgmr.msra.gmra.mxu1 %vm374_vm2, %v298_v6 }
 0x13e   : > { %665 = vmatprep.mubr.msk.bf16.mxu1 %vm904_vm0, %v903_v0 }
 0x1fd   : > { %v412_v14 = vpop.f32.mrf.mxu1 }
 0x1ff   : > { %v661_v15 = vpop.f32.mrf.mxu1 }
 0x201   : > { %v415_v16 = vpop.f32.mrf.mxu1 }
 0x202   : > { %v419_v17 = vpack.c.bf16 %v415_v16, %v412_v14 }
 0x203   : > { %v662_v18 = vpop.f32.mrf.mxu1 }
 0x204   : > { %664 = vmatpush3.bf16.msra.mxu1 %v419_v17 }
 0x207   : > { %666 = vmatmul.mubr.msk.bf16.vlgmr.msra.gmra.mxu1 %vm374_vm2, %v298_v6 }
 0x2c7   : > { %v471_v23 = vpop.f32.mrf.mxu1 }
 0x2c8   : > { %v472_v25 = vadd.f32 %v471_v23, %v435_v21 }
 0x2c9   : > { %v667_v27 = vpop.f32.mrf.mxu1 }
 0x2ca   : > { %v485_v28 = vadd.f32 %v633_v24, %v472_v25 }
 0x2cb   : > { %v474_v29 = vpop.f32.mrf.mxu1 }
 0x2cc   : > { %v487_v30 = vmax.f32 %v485_v28, 0.0  ;;  %v475_v31 = vadd.f32 %v474_v29, %v436_v26 }
 0x2cd   : > { %v668_v32 = vpop.f32.mrf.mxu1 }
 0x2ce   : > { %489 = vst [vmem:[%s296_s15] sm:$0xff] %v487_v30  ;;  %v486_v33 = vadd.f32 %v633_v24, %v475_v31 }
 0x2d0   : > { %v488_v34 = vmax.f32 %v486_v33, 0.0 }
 0x2d2   : > { %490 = vst [vmem:[%s296_s15 + $0x8] sm:$0xff] %v488_v34 }
 0x2d3   : > { %837 = shalt.err (!%p834_p11)
}
 0x2d4   : > { %s838_s27 = scalar_lea.hbm %s1139_s28, 256  ;;  %s842_s26 = scalar_lea.hbm %s1186_s5, 1024 }
 0x2d5   : > { %p839_p1 = scmp.ne.s32.totalorder %s1139_s28, %s838_s27  ;;  %p843_p7 = scmp.lt.s32.totalorder %s1139_s28, %s1186_s5 }
 0x2d6   : > { %p844_p8 = scmp.lt.s32.totalorder %s842_s26, %s838_s27 }
 0x2d7   : > { %p840_p4 = pnand %p839_p1, %p1213_p9 }
 0x2d8   : > { %p845_p10 = por %p844_p8, %p843_p7 }
 0x2d9   : > { %p841_p3 = pneg %p840_p4 }
 0x2db   : > { %p846_p6 = pnand %p845_p10, %p841_p3 }
 0x2dd   : > { %849 = shalt.err (!%p846_p6)
}
 0x2de   : > { %s906_s10 = smov 128   ;;  %s907_s11 = smov 8  }
 0x2df   : > { %677 = dma.vmem_to_hbm [thread:$0]  (%p1213_p9), %s1134_s9, 256, %s1139_s28, %s492_s6, %s906_s10, %s906_s10, %s907_s11  }
 0x2e0 PF: > { %p697_p12 = scmp.ge.s32.totalorder %s896_s21, 2  ;;  %s520_s29 = sand.u32 1, %s884_s18  }
 0x2e1   : > { %p1214_p13 = scmp.ne.s32.totalorder %s1199_s25, 0  ;;  %s521_s15 = scalar_lea.sflag [#allocation4], %s520_s29 }
 0x2e3   : > { %p691_p0 = pnand %p697_p12, %p1214_p13 }
 0x2e5   : > { %p692_p5 = pneg %p691_p0 }
 0x2e7   : > { %879 = dma.done.wait (%p692_p5), %s521_s15, 256  }
 0x2e8   : > { %881 = vsyncadd (%p692_p5), %s521_s15, 4294967040  ;;  %s1215_s16 = sld [smem:[#allocation13_spill]]  ;;  %p21_p2 = scmp.ge.s32.totalorder %s991_s30, 6  }
 0x2e9   : > { %s1216_s20 = sld [smem:[#allocation14_spill]]  ;;  %s1217_s18 = smov %s888_s19 }
 0x2ea   : > { %s1219_s21 = smov %s991_s30  ;;  %23 = sbr.rel (!%p21_p2) target bundleno = 10 (0xa), region = 102 }
 0x2ee   : > { %s1218_s19 = smov %s1215_s16 }
 0x2ef   :  { %526 = vsyncpa [#allocation3], 1 }
 0x2f0   :  { %528 = vsyncpa [#allocation3 + $0x1], 1 }
 0x2f1   :  { %529 = vsyncpa [#allocation6], 1 }
 0x2f2   :  { %531 = vsyncpa [#allocation6 + $0x1], 1 }
 0x2f3   :  { %532 = vsyncpa [#allocation4], 1 }
 0x2f4   :  { %534 = vsyncpa [#allocation4 + $0x1], 1 }

</bundles_post_ra>
